<compile_context>
chip_gen: v7x
topology: tpu7x:2x2x1
jax: 0.10.0
libtpu: 0.0.40
codegen_flags: <defaults>
</compile_context>

<pallas_src>
import math
import functools

import jax
import jax.numpy as jnp
from jax.experimental import pallas as pl
from jax.experimental.pallas import tpu as pltpu

_LANE = 128        # vreg lane width: pad feature dims to this for lane-dense stores
_SUBLANE = 8       # vreg sublane width: batch tiles must be a multiple of this
_MAX_TILE_B = 512  # batch tile cap (keeps 2x double-buffered tiles tiny vs VMEM)


def _round_up(x, m):
    return ((x + m - 1) // m) * m


def _fused_mlp_kernel(scale_ref, *refs, n_layers):
    """Fused MLP over one batch tile.

    refs = (x_ref, w0, b0, w1, b1, ..., o_ref); scale_ref is a (1,) f32 in SMEM.
    h = x; for each layer: h = h @ W + b (ReLU on all but the last);
    o = h * scale   (scale = exp(-noise_pow_param)).
    Intermediates never leave vregs/VMEM.
    """
    x_ref = refs[0]
    o_ref = refs[-1]
    wb_refs = refs[1:-1]

    h = x_ref[...]
    for li in range(n_layers):
        w = wb_refs[2 * li][...]
        b = wb_refs[2 * li + 1][...]          # (1, out_pad) -> broadcast add
        h = jnp.dot(h, w, preferred_element_type=jnp.float32) + b
        if li != n_layers - 1:                # activation popped after last Linear
            h = jnp.maximum(h, 0.0)
    o_ref[...] = (h * scale_ref[0]).astype(o_ref.dtype)


def init_noise_generator_params(key, in_features, hidden_layers):
    """Deterministic init mimicking nn.Linear default (uniform +-1/sqrt(fan_in))."""
    layers = [in_features] + list(hidden_layers)
    params = []
    for i in range(1, len(layers)):
        fan_in, fan_out = layers[i - 1], layers[i]
        key, kw, kb = jax.random.split(key, 3)
        bound = 1.0 / math.sqrt(fan_in)
        # stored as (in, out); equivalent to PyTorch W (out, in) transposed
        w = jax.random.uniform(kw, (fan_in, fan_out), jnp.float32, -bound, bound)
        b = jax.random.uniform(kb, (1, fan_out), jnp.float32, -bound, bound)
        params.append((w, b))
    return params


def noise_generator_forward(x, params, noise_pow_param):
    """NoiseGenerator forward: Linear -> ReLU -> ... -> Linear, then / exp(p).

    One fused pallas_call; the division is a multiply by exp(-p) passed as a
    runtime SMEM scalar.  min_ie_time from the PyTorch module is stored but
    unused in forward, so it has no kernel counterpart.
    """
    batch, in_features = x.shape
    n_layers = len(params)
    out_features = params[-1][0].shape[1]

    # --- lane-dense zero padding of all feature dims (exact math) ---
    in_pad = _round_up(in_features, _LANE)
    out_pads = [_round_up(w.shape[1], _LANE) for (w, _) in params]

    # --- batch tiling (sublane aligned, capped) ---
    tile_b = min(_MAX_TILE_B, _round_up(batch, _SUBLANE))
    batch_pad = _round_up(batch, tile_b)

    x_p = jnp.zeros((batch_pad, in_pad), jnp.float32)
    x_p = x_p.at[:batch, :in_features].set(x.astype(jnp.float32))

    padded_params = []
    prev_pad = in_pad
    for (w, b), out_pad in zip(params, out_pads):
        fin, fout = w.shape
        w_p = jnp.zeros((prev_pad, out_pad), jnp.float32).at[:fin, :fout].set(w)
        b_p = jnp.zeros((1, out_pad), jnp.float32).at[:, :fout].set(
            jnp.reshape(b, (1, fout)))
        padded_params.append((w_p, b_p))
        prev_pad = out_pad
    out_pad_last = out_pads[-1]

    # runtime scalar in SMEM: no recompile when noise_pow_param changes
    scale = jnp.exp(-jnp.asarray(noise_pow_param, jnp.float32)).reshape((1,))

    grid = (batch_pad // tile_b,)

    in_specs = [pl.BlockSpec(memory_space=pltpu.MemorySpace.SMEM)]       # scale
    in_specs.append(pl.BlockSpec((tile_b, in_pad), lambda i: (i, 0)))    # x tile
    flat_inputs = [scale, x_p]
    for (w_p, b_p) in padded_params:
        in_specs.append(pl.BlockSpec(w_p.shape, lambda i: (0, 0)))       # resident W
        in_specs.append(pl.BlockSpec(b_p.shape, lambda i: (0, 0)))       # resident b
        flat_inputs.extend([w_p, b_p])

    kernel = functools.partial(_fused_mlp_kernel, n_layers=n_layers)

    out_padded = pl.pallas_call(
        kernel,
        out_shape=jax.ShapeDtypeStruct((batch_pad, out_pad_last), jnp.float32),
        grid=grid,
        in_specs=in_specs,
        out_specs=pl.BlockSpec((tile_b, out_pad_last), lambda i: (i, 0)),
        compiler_params=pltpu.CompilerParams(
            dimension_semantics=("parallel",),          # megacore-shard the batch
            vmem_limit_bytes=32 * 1024 * 1024,          # explicit (v7x: 64 MiB phys)
        ),
    )(*flat_inputs)

    return out_padded[:batch, :out_features]


if __name__ == "__main__":
    # Small shapes consistent with the module: MLP over feature vectors.
    batch = 4
    in_features = 8
    hidden_layers = [32, 16]          # self.layers = [8, 32, 16]
    noise_pow_param = 1.5
    # min_ie_time is stored but unused in forward; noise_act = RELU.

    key = jax.random.PRNGKey(0)
    key, kx = jax.random.split(key)
    x = jax.random.normal(kx, (batch, in_features), dtype=jnp.float32)

    params = init_noise_generator_params(key, in_features, hidden_layers)

    fwd = jax.jit(noise_generator_forward)
    out = fwd(x, params, noise_pow_param)
    out = jax.block_until_ready(out)

    # Reference check in plain JAX (same math as the PyTorch module).
    h = x
    for li, (w, b) in enumerate(params):
        h = h @ w + b
        if li != len(params) - 1:
            h = jnp.maximum(h, 0.0)
    ref = h / jnp.exp(jnp.float32(noise_pow_param))
    assert out.shape == ref.shape, "shape mismatch vs reference"
    assert jnp.allclose(out, ref, atol=1e-5, rtol=1e-5), "mismatch vs reference"

    print("KERNEL_OK")
</pallas_src>

<mosaic_0001>
module attributes {stable_mosaic.version = 11 : i64} {
  func.func @_fused_mlp_kernel(%arg0: i32, %arg1: memref<1xf32, #tpu.memory_space<smem>>, %arg2: memref<8x128xf32, #tpu.memory_space<vmem>>, %arg3: memref<128x128xf32, #tpu.memory_space<vmem>>, %arg4: memref<1x128xf32, #tpu.memory_space<vmem>>, %arg5: memref<128x128xf32, #tpu.memory_space<vmem>>, %arg6: memref<1x128xf32, #tpu.memory_space<vmem>>, %arg7: memref<8x128xf32, #tpu.memory_space<vmem>>) attributes {dimension_semantics = [#tpu.dimension_semantics<parallel>], iteration_bounds = array<i64: 1>, scalar_prefetch = 0 : i64, scratch_operands = 0 : i64, tpu.core_type = #tpu.core_type<tc>, window_params = [{transform_indices = @transform_0, window_bounds = array<i64: 1>}, {transform_indices = @transform_1, window_bounds = array<i64: 8, 128>}, {pipeline_mode = #tpu.pipeline_mode<synchronous>, transform_indices = @transform_2, window_bounds = array<i64: 128, 128>}, {pipeline_mode = #tpu.pipeline_mode<synchronous>, transform_indices = @transform_3, window_bounds = array<i64: 1, 128>}, {pipeline_mode = #tpu.pipeline_mode<synchronous>, transform_indices = @transform_4, window_bounds = array<i64: 128, 128>}, {pipeline_mode = #tpu.pipeline_mode<synchronous>, transform_indices = @transform_5, window_bounds = array<i64: 1, 128>}, {transform_indices = @transform_6, window_bounds = array<i64: 8, 128>}]} {
    %c0 = arith.constant 0 : index
    %c0_0 = arith.constant 0 : index
    %0 = vector.load %arg2[%c0, %c0_0] : memref<8x128xf32, #tpu.memory_space<vmem>>, vector<8x128xf32>
    %c0_1 = arith.constant 0 : index
    %c0_2 = arith.constant 0 : index
    %1 = vector.load %arg3[%c0_1, %c0_2] : memref<128x128xf32, #tpu.memory_space<vmem>>, vector<128x128xf32>
    %c0_3 = arith.constant 0 : index
    %c0_4 = arith.constant 0 : index
    %2 = vector.load %arg4[%c0_3, %c0_4] : memref<1x128xf32, #tpu.memory_space<vmem>>, vector<1x128xf32>
    %cst = arith.constant dense<0.000000e+00> : vector<8x128xf32>
    %3 = tpu.matmul %0, %1, %cst {dimension_numbers = #tpu.dot_dimension_numbers<[1], [0], [0], [1], [0, 0, 1, 1], [], []>} : vector<8x128xf32>, vector<128x128xf32>, vector<8x128xf32> -> vector<8x128xf32>
    %4 = vector.broadcast %2 : vector<1x128xf32> to vector<8x128xf32>
    %5 = arith.addf %3, %4 : vector<8x128xf32>
    %cst_5 = arith.constant 0.000000e+00 : f32
    %6 = vector.broadcast %cst_5 : f32 to vector<8x128xf32>
    %7 = arith.maximumf %5, %6 : vector<8x128xf32>
    %c0_6 = arith.constant 0 : index
    %c0_7 = arith.constant 0 : index
    %8 = vector.load %arg5[%c0_6, %c0_7] : memref<128x128xf32, #tpu.memory_space<vmem>>, vector<128x128xf32>
    %c0_8 = arith.constant 0 : index
    %c0_9 = arith.constant 0 : index
    %9 = vector.load %arg6[%c0_8, %c0_9] : memref<1x128xf32, #tpu.memory_space<vmem>>, vector<1x128xf32>
    %cst_10 = arith.constant dense<0.000000e+00> : vector<8x128xf32>
    %10 = tpu.matmul %7, %8, %cst_10 {dimension_numbers = #tpu.dot_dimension_numbers<[1], [0], [0], [1], [0, 0, 1, 1], [], []>} : vector<8x128xf32>, vector<128x128xf32>, vector<8x128xf32> -> vector<8x128xf32>
    %11 = vector.broadcast %9 : vector<1x128xf32> to vector<8x128xf32>
    %12 = arith.addf %10, %11 : vector<8x128xf32>
    %c0_11 = arith.constant 0 : index
    %13 = memref.load %arg1[%c0_11] : memref<1xf32, #tpu.memory_space<smem>>
    %14 = vector.broadcast %13 : f32 to vector<8x128xf32>
    %15 = arith.mulf %12, %14 : vector<8x128xf32>
    %c0_12 = arith.constant 0 : index
    %c0_13 = arith.constant 0 : index
    %16 = vector.load %arg7[%c0_12, %c0_13] : memref<8x128xf32, #tpu.memory_space<vmem>>, vector<8x128xf32>
    tpu.vector_store %arg7[%c0_12, %c0_13], %15 {strides = array<i32>} : memref<8x128xf32, #tpu.memory_space<vmem>>, vector<8x128xf32>,
    return
  }
  func.func @transform_0(%arg0: i32) -> i32 {
    %c0_i32 = arith.constant 0 : i32
    %c0_i32_0 = arith.constant 0 : i32
    return %c0_i32 : i32
  }
  func.func @transform_1(%arg0: i32) -> (i32, i32) {
    %c0_i32 = arith.constant 0 : i32
    %c0_i32_0 = arith.constant 0 : i32
    return %arg0, %c0_i32 : i32, i32
  }
  func.func @transform_2(%arg0: i32) -> (i32, i32) {
    %c0_i32 = arith.constant 0 : i32
    %c0_i32_0 = arith.constant 0 : i32
    %c0_i32_1 = arith.constant 0 : i32
    return %c0_i32, %c0_i32_0 : i32, i32
  }
  func.func @transform_3(%arg0: i32) -> (i32, i32) {
    %c0_i32 = arith.constant 0 : i32
    %c0_i32_0 = arith.constant 0 : i32
    %c0_i32_1 = arith.constant 0 : i32
    return %c0_i32, %c0_i32_0 : i32, i32
  }
  func.func @transform_4(%arg0: i32) -> (i32, i32) {
    %c0_i32 = arith.constant 0 : i32
    %c0_i32_0 = arith.constant 0 : i32
    %c0_i32_1 = arith.constant 0 : i32
    return %c0_i32, %c0_i32_0 : i32, i32
  }
  func.func @transform_5(%arg0: i32) -> (i32, i32) {
    %c0_i32 = arith.constant 0 : i32
    %c0_i32_0 = arith.constant 0 : i32
    %c0_i32_1 = arith.constant 0 : i32
    return %c0_i32, %c0_i32_0 : i32, i32
  }
  func.func @transform_6(%arg0: i32) -> (i32, i32) {
    %c0_i32 = arith.constant 0 : i32
    %c0_i32_0 = arith.constant 0 : i32
    return %arg0, %c0_i32 : i32, i32
  }
}

</mosaic_0001>

<bundles_post_ra>
// kernel: noise_generator_forward.1
= control target key start
LH: loop header
LB: loop body
LE: loop exit
PB: predicated region body
PF: predicated region fallthrough
CT: control target
= control target key end

     0   :  { %v377_v0 = vmov 0.0|0.0   ;;  %vm378_vm0 = vmmov 0   ;;  %v379_v4 = vmov 0.0   ;;  %s542_s2 = inlined_call_operand.vmem [shape: f32[128,128], index: 2, kind: input, shape index: {}]   ;;  %s543_s4 = inlined_call_operand.vmem [shape: f32[128,128], index: 4, kind: input, shape index: {}]   ;;  %s544_s1 = inlined_call_operand.vmem [shape: f32[8,128], index: 1, kind: input, shape index: {}]   ;;  %s545_s3 = inlined_call_operand.vmem [shape: f32[1,128], index: 3, kind: input, shape index: {}]   ;;  %s546_s5 = inlined_call_operand.vmem [shape: f32[1,128], index: 5, kind: input, shape index: {}]   ;;  %s547_s0 = inlined_call_operand.<no memory space> [shape: f32[1], index: 0, kind: input, shape index: {}]   ;;  %s548_s6 = inlined_call_operand.vmem [shape: f32[8,128], index: 6, kind: output, shape index: {}]  }
   0x1   :  { %326 = vmatprep.subr.bf16.mxu0 %v377_v0  ;;  %v25_v1 = vld [vmem:[%s542_s2] sm:$0xff]  ;;  %v26_v2 = vld [vmem:[%s542_s2 + $0x8] sm:$0xff]  ;;  %v27_v3 = vld [vmem:[%s542_s2 + $0x10] sm:$0xff]  ;;  %288 = vmatprep.mubr.msk.f32.mxu0 %vm378_vm0, %v379_v4  ;;  %v213_v58 = vstv %s547_s0 }
   0x2   :  { %v327_v5 = vpack.c.bf16 %v26_v2, %v25_v1  ;;  %v28_v6 = vld [vmem:[%s542_s2 + $0x18] sm:$0xff]  ;;  %350 = vmatprep.subr.bf16.mxu1 %v377_v0  ;;  %323 = vmatprep.mubr.msk.f32.mxu1 %vm378_vm0, %v379_v4  ;;  %v29_v8 = vld [vmem:[%s542_s2 + $0x20] sm:$0xff]  ;;  %v30_v9 = vld [vmem:[%s542_s2 + $0x28] sm:$0xff] }
   0x3   :  { %v330_v7 = vpack.c.bf16 %v28_v6, %v27_v3  ;;  %v119_v10 = vld [vmem:[%s543_s4] sm:$0xff]  ;;  %v120_v11 = vld [vmem:[%s543_s4 + $0x8] sm:$0xff]  ;;  %v121_v12 = vld [vmem:[%s543_s4 + $0x10] sm:$0xff]  ;;  %v333_v14 = vpack.c.bf16 %v30_v9, %v29_v8 }
   0x4   :  { %328 = vmatpush3.bf16.msra.mxu0 %v327_v5  ;;  %v122_v13 = vld [vmem:[%s543_s4 + $0x18] sm:$0xff]  ;;  %v351_v15 = vpack.c.bf16 %v120_v11, %v119_v10  ;;  %v31_v16 = vld [vmem:[%s542_s2 + $0x30] sm:$0xff]  ;;  %v123_v19 = vld [vmem:[%s543_s4 + $0x20] sm:$0xff] }
   0x5   :  { %329 = vmatprep.subr.bf16.mxu0 %v377_v0  ;;  %v32_v17 = vld [vmem:[%s542_s2 + $0x38] sm:$0xff]  ;;  %v354_v18 = vpack.c.bf16 %v122_v13, %v121_v12  ;;  %v124_v20 = vld [vmem:[%s543_s4 + $0x28] sm:$0xff]  ;;  %v33_v22 = vld [vmem:[%s542_s2 + $0x40] sm:$0xff] }
   0x6   :  { %352 = vmatpush3.bf16.msra.mxu1 %v351_v15  ;;  %v336_v21 = vpack.c.bf16 %v32_v17, %v31_v16  ;;  %v34_v23 = vld [vmem:[%s542_s2 + $0x48] sm:$0xff]  ;;  %v357_v24 = vpack.c.bf16 %v124_v20, %v123_v19  ;;  %v125_v25 = vld [vmem:[%s543_s4 + $0x30] sm:$0xff]  ;;  %v126_v26 = vld [vmem:[%s543_s4 + $0x38] sm:$0xff] }
   0x7   :  { %353 = vmatprep.subr.bf16.mxu1 %v377_v0  ;;  %v339_v27 = vpack.c.bf16 %v34_v23, %v33_v22  ;;  %v35_v28 = vld [vmem:[%s542_s2 + $0x50] sm:$0xff]  ;;  %v36_v29 = vld [vmem:[%s542_s2 + $0x58] sm:$0xff]  ;;  %v360_v30 = vpack.c.bf16 %v126_v26, %v125_v25  ;;  %v127_v31 = vld [vmem:[%s543_s4 + $0x40] sm:$0xff] }
   0x8   :  { %331 = vmatpush3.bf16.msra.mxu0 %v330_v7  ;;  %v128_v32 = vld [vmem:[%s543_s4 + $0x48] sm:$0xff]  ;;  %v342_v33 = vpack.c.bf16 %v36_v29, %v35_v28  ;;  %v37_v34 = vld [vmem:[%s542_s2 + $0x60] sm:$0xff]  ;;  %v129_v37 = vld [vmem:[%s543_s4 + $0x50] sm:$0xff] }
   0x9   :  { %332 = vmatprep.subr.bf16.mxu0 %v377_v0  ;;  %v38_v35 = vld [vmem:[%s542_s2 + $0x68] sm:$0xff]  ;;  %v363_v36 = vpack.c.bf16 %v128_v32, %v127_v31  ;;  %v130_v38 = vld [vmem:[%s543_s4 + $0x58] sm:$0xff]  ;;  %v39_v40 = vld [vmem:[%s542_s2 + $0x70] sm:$0xff] }
   0xa   :  { %355 = vmatpush3.bf16.msra.mxu1 %v354_v18  ;;  %v345_v39 = vpack.c.bf16 %v38_v35, %v37_v34  ;;  %v40_v41 = vld [vmem:[%s542_s2 + $0x78] sm:$0xff]  ;;  %v366_v42 = vpack.c.bf16 %v130_v38, %v129_v37  ;;  %v131_v43 = vld [vmem:[%s543_s4 + $0x60] sm:$0xff]  ;;  %v132_v44 = vld [vmem:[%s543_s4 + $0x68] sm:$0xff] }
   0xb   :  { %356 = vmatprep.subr.bf16.mxu1 %v377_v0  ;;  %v348_v45 = vpack.c.bf16 %v40_v41, %v39_v40  ;;  %v369_v46 = vpack.c.bf16 %v132_v44, %v131_v43  ;;  %v24_v47 = vld [vmem:[%s544_s1] sm:$0xff]  ;;  %v133_v48 = vld [vmem:[%s543_s4 + $0x70] sm:$0xff]  ;;  %v134_v49 = vld [vmem:[%s543_s4 + $0x78] sm:$0xff] }
   0xc   :  { %334 = vmatpush3.bf16.msra.mxu0 %v333_v14  ;;  %v372_v50 = vpack.c.bf16 %v134_v49, %v133_v48  ;;  %v220_v51 = vld [vmem:[%s545_s3] ss:$0 sm:$0xff] }
   0xd   :  { %335 = vmatprep.subr.bf16.mxu0 %v377_v0  ;;  %v221_v56 = vld [vmem:[%s546_s5] ss:$0 sm:$0xff] }
   0xe   :  { %358 = vmatpush3.bf16.msra.mxu1 %v357_v24 }
   0xf   :  { %359 = vmatprep.subr.bf16.mxu1 %v377_v0 }
  0x10   :  { %337 = vmatpush3.bf16.msra.mxu0 %v336_v21 }
  0x11   :  { %338 = vmatprep.subr.bf16.mxu0 %v377_v0 }
  0x12   :  { %361 = vmatpush3.bf16.msra.mxu1 %v360_v30 }
  0x13   :  { %362 = vmatprep.subr.bf16.mxu1 %v377_v0 }
  0x14   :  { %340 = vmatpush3.bf16.msra.mxu0 %v339_v27 }
  0x15   :  { %341 = vmatprep.subr.bf16.mxu0 %v377_v0 }
  0x16   :  { %364 = vmatpush3.bf16.msra.mxu1 %v363_v36 }
  0x17   :  { %365 = vmatprep.subr.bf16.mxu1 %v377_v0 }
  0x18   :  { %343 = vmatpush3.bf16.msra.mxu0 %v342_v33 }
  0x19   :  { %344 = vmatprep.subr.bf16.mxu0 %v377_v0 }
  0x1a   :  { %367 = vmatpush3.bf16.msra.mxu1 %v366_v42 }
  0x1b   :  { %368 = vmatprep.subr.bf16.mxu1 %v377_v0 }
  0x1c   :  { %346 = vmatpush3.bf16.msra.mxu0 %v345_v39 }
  0x1d   :  { %347 = vmatprep.subr.bf16.mxu0 %v377_v0 }
  0x1e   :  { %370 = vmatpush3.bf16.msra.mxu1 %v369_v46 }
  0x1f   :  { %371 = vmatprep.subr.bf16.mxu1 %v377_v0 }
  0x20   :  { %349 = vmatpush3.bf16.msra.mxu0 %v348_v45 }
  0x22   :  { %373 = vmatpush3.bf16.msra.mxu1 %v372_v50 }
  0x23   :  { %289 = vmatmul.mubr.f32.vlgmr.msra.gmra.mrb[0].mxu0 %v24_v47 }
  0xf6   :  { %v114_v52 = vpop.f32.mrb[0].mxu0 }
  0xf7   :  { %v115_v53 = vadd.f32 %v220_v51, %v114_v52  ;;  %v290_v54 = vpop.f32.mrb[1].mxu0 }
  0xf9   :  { %v118_v55 = vmax.f32 %v115_v53, 0.0 }
  0xfb   :  { %324 = vmatmul.mubr.f32.vlgmr.msra.gmra.mrb[0].mxu1 %v118_v55 }
 0x1ce   :  { %v208_v57 = vpop.f32.mrb[0].mxu1 }
 0x1cf   :  { %v209_v59 = vadd.f32 %v221_v56, %v208_v57  ;;  %v325_v60 = vpop.f32.mrb[1].mxu1 }
 0x1d1   :  { %v214_v61 = vmul.f32 %v213_v58, %v209_v59 }
 0x1d3   :  { %215 = vst [vmem:[%s548_s6] sm:$0xff] %v214_v61 }

</bundles_post_ra>
